<compile_context>
chip_gen: v7x
topology: tpu7x:2x2x1
jax: 0.10.0
libtpu: 0.0.40
codegen_flags: <defaults>
</compile_context>

<pallas_src>
import jax
import jax.numpy as jnp
from jax.experimental import pallas as pl
from jax.experimental.pallas import tpu as pltpu


_GN_EPS = 1e-6
_NUM_GROUPS = 32
_VMEM_LIMIT_BYTES = 48 * 1024 * 1024   # fits v7x's 64 MiB VMEM; plenty of headroom on v5e/v6e


def _compiler_params():
    return pltpu.CompilerParams(
        dimension_semantics=("parallel",),
        vmem_limit_bytes=_VMEM_LIMIT_BYTES,
    )


def _one_hot_groups(C, num_groups=_NUM_GROUPS):
    gs = C // num_groups
    return (jnp.arange(C)[:, None] // gs == jnp.arange(num_groups)[None, :]).astype(jnp.float32)


# ----------------------------------------------------------------------------
# In-kernel helpers (traced inside Pallas kernels)
# ----------------------------------------------------------------------------

def _group_norm(x, gamma, beta, oh, *, eps, silu):
    """GroupNorm(32, C) over (channels-in-group, L) per sample, optional SiLU.  x: (L, C) f32."""
    L, C = x.shape
    G = oh.shape[1]
    inv_n = 1.0 / float(L * (C // G))                        # precomputed 1/n (no divides)
    ch_sum = jnp.sum(x, axis=0, keepdims=True)               # (1, C)
    ch_sq = jnp.sum(x * x, axis=0, keepdims=True)            # (1, C)
    g_sum = jnp.dot(ch_sum, oh, preferred_element_type=jnp.float32)   # (1, G)
    g_sq = jnp.dot(ch_sq, oh, preferred_element_type=jnp.float32)     # (1, G)
    mean_g = g_sum * inv_n
    var_g = jnp.maximum(g_sq * inv_n - mean_g * mean_g, 0.0)          # clamp >= 0
    rstd_g = jax.lax.rsqrt(var_g + eps)
    mean_c = jnp.dot(mean_g, oh.T, preferred_element_type=jnp.float32)  # (1, C)
    rstd_c = jnp.dot(rstd_g, oh.T, preferred_element_type=jnp.float32)  # (1, C)
    y = (x - mean_c) * rstd_c * gamma + beta
    if silu:
        y = y * jax.nn.sigmoid(y)
    return y


def _conv_taps_matmul(y, w_ref, *, K, padl, padr):
    """Stride-1 'same' conv as K shifted matmuls on the resident VMEM tile.

    y: (L, Cin) f32 (already normalized / activated); w_ref: (K, Cin, Cout) bf16.
    Zero padding happens here, AFTER normalization (matches Conv1d padding semantics),
    so no padded / K-stacked copies ever hit HBM.
    """
    L, Cin = y.shape
    if padl > 0 or padr > 0:
        parts = []
        if padl > 0:
            parts.append(jnp.zeros((padl, Cin), y.dtype))
        parts.append(y)
        if padr > 0:
            parts.append(jnp.zeros((padr, Cin), y.dtype))
        ypad = jnp.concatenate(parts, axis=0)                # (L + padl + padr, Cin)
    else:
        ypad = y
    Lout = L + padl + padr - K + 1
    acc = None
    for k in range(K):
        tap = ypad[k:k + Lout, :].astype(jnp.bfloat16)
        d = jnp.dot(tap, w_ref[k], preferred_element_type=jnp.float32)
        acc = d if acc is None else acc + d
    return acc                                               # (Lout, Cout) f32


# ----------------------------------------------------------------------------
# Pallas kernels
# ----------------------------------------------------------------------------

def _make_fused_conv_kernel(*, K, padl, padr, gn, silu, eps, res, nin):
    """[GroupNorm(+SiLU)] -> stride-1 conv (+bias) [+ residual or fused 1x1 nin-shortcut]."""
    def kernel(*refs):
        i = 0
        x_ref = refs[i]; i += 1
        r_ref = None
        if res:
            r_ref = refs[i]; i += 1
        if gn:
            g_ref, bt_ref, oh_ref = refs[i], refs[i + 1], refs[i + 2]; i += 3
        w_ref, wb_ref = refs[i], refs[i + 1]; i += 2
        if nin:
            wn_ref, bn_ref = refs[i], refs[i + 1]; i += 2
        o_ref = refs[i]

        x = x_ref[0].astype(jnp.float32)                     # (L, Cin)
        if gn:
            y = _group_norm(x, g_ref[...], bt_ref[...], oh_ref[...], eps=eps, silu=silu)
        else:
            y = x
        acc = _conv_taps_matmul(y, w_ref, K=K, padl=padl, padr=padr)
        acc = acc + wb_ref[...].astype(jnp.float32)          # conv bias
        if res:
            if nin:                                          # fused 1x1 nin_shortcut on residual
                acc = acc + (jnp.dot(r_ref[0].astype(jnp.bfloat16), wn_ref[...],
                                     preferred_element_type=jnp.float32)
                             + bn_ref[...].astype(jnp.float32))
            else:
                acc = acc + r_ref[0].astype(jnp.float32)
        o_ref[0] = acc.astype(o_ref.dtype)
    return kernel


def _make_attn_kernel(*, eps, scale):
    """GroupNorm -> fused QKV projection -> softmax(QK^T * scale) V -> proj -> +x."""
    def kernel(x_ref, g_ref, bt_ref, oh_ref, wqkv_ref, bqkv_ref, wp_ref, bp_ref, o_ref):
        x = x_ref[0].astype(jnp.float32)                     # (L, C)
        C = x.shape[1]
        h = _group_norm(x, g_ref[...], bt_ref[...], oh_ref[...], eps=eps, silu=False)
        qkv = (jnp.dot(h.astype(jnp.bfloat16), wqkv_ref[...],
                       preferred_element_type=jnp.float32)
               + bqkv_ref[...].astype(jnp.float32))          # (L, 3C) f32
        qf = qkv[:, 0:C]
        kf = qkv[:, C:2 * C]
        v = qkv[:, 2 * C:3 * C].astype(jnp.bfloat16)
        s = jnp.dot(qf.astype(jnp.bfloat16), kf.T.astype(jnp.bfloat16),
                    preferred_element_type=jnp.float32) * scale          # (L, L)
        s = s - jnp.max(s, axis=-1, keepdims=True)
        p = jnp.exp(s)
        p = p * pl.reciprocal(jnp.sum(p, axis=-1, keepdims=True), approx=True)
        a = jnp.dot(p.astype(jnp.bfloat16), v, preferred_element_type=jnp.float32)
        proj = (jnp.dot(a.astype(jnp.bfloat16), wp_ref[...],
                        preferred_element_type=jnp.float32)
                + bp_ref[...].astype(jnp.float32))
        o_ref[0] = (x + proj).astype(o_ref.dtype)
    return kernel


def _matmul_bias_kernel(x_ref, w_ref, b_ref, o_ref):
    # Single matmul over the K*Cin contraction (used for the stride-2 downsample conv).
    o_ref[0] = (jnp.dot(x_ref[0], w_ref[...], preferred_element_type=jnp.float32)
                + b_ref[...].astype(jnp.float32)).astype(o_ref.dtype)


# ----------------------------------------------------------------------------
# Wrappers
# ----------------------------------------------------------------------------

def fused_conv(x, conv_w, conv_b, *, gn_params=None, silu=False, residual=None,
               nin_params=None, out_dtype=jnp.bfloat16):
    """[GroupNorm(+SiLU)] + stride-1 Conv1d(padding=K//2) [+residual / fused nin] in one kernel.

    x: (B, L, Cin) channels-last; conv_w: PyTorch (Cout, Cin, K); conv_b: (Cout,)."""
    B, L, Cin = x.shape
    Cout, _, K = conv_w.shape
    padl = padr = K // 2
    res = residual is not None
    nin = nin_params is not None

    args = [x]
    in_specs = [pl.BlockSpec((1, L, Cin), lambda i: (i, 0, 0))]
    if res:
        Cr = residual.shape[-1]
        args.append(residual)
        in_specs.append(pl.BlockSpec((1, L, Cr), lambda i: (i, 0, 0)))
    gn = gn_params is not None
    if gn:
        gamma, beta = gn_params
        args += [gamma.reshape(1, Cin).astype(jnp.float32),
                 beta.reshape(1, Cin).astype(jnp.float32),
                 _one_hot_groups(Cin)]
        in_specs += [pl.BlockSpec((1, Cin), lambda i: (0, 0)),
                     pl.BlockSpec((1, Cin), lambda i: (0, 0)),
                     pl.BlockSpec((Cin, _NUM_GROUPS), lambda i: (0, 0))]
    wt = jnp.transpose(conv_w, (2, 1, 0)).astype(jnp.bfloat16)   # (K, Cin, Cout)
    bias = conv_b.reshape(1, Cout).astype(jnp.float32)
    args += [wt, bias]
    in_specs += [pl.BlockSpec((K, Cin, Cout), lambda i: (0, 0, 0)),
                 pl.BlockSpec((1, Cout), lambda i: (0, 0))]
    if nin:
        wn, bn = nin_params                                       # wn: (Cout, Cr, 1)
        args += [wn[:, :, 0].T.astype(jnp.bfloat16), bn.reshape(1, Cout).astype(jnp.float32)]
        in_specs += [pl.BlockSpec((residual.shape[-1], Cout), lambda i: (0, 0)),
                     pl.BlockSpec((1, Cout), lambda i: (0, 0))]

    kernel = _make_fused_conv_kernel(K=K, padl=padl, padr=padr, gn=gn, silu=silu,
                                     eps=_GN_EPS, res=res, nin=nin)
    return pl.pallas_call(
        kernel,
        out_shape=jax.ShapeDtypeStruct((B, L, Cout), out_dtype),
        grid=(B,),
        in_specs=in_specs,
        out_specs=pl.BlockSpec((1, L, Cout), lambda i: (i, 0, 0)),
        compiler_params=_compiler_params(),
    )(*args)


def attn_block(x, p):
    """AttnBlock1D with GroupNorm + fused QKV + softmax + proj + residual in one kernel."""
    B, L, C = x.shape
    gamma = p["gn"][0].reshape(1, C).astype(jnp.float32)
    beta = p["gn"][1].reshape(1, C).astype(jnp.float32)
    oh = _one_hot_groups(C)

    def wmat(conv_w):
        return conv_w[:, :, 0].T                                  # (Cin, Cout)

    wqkv = jnp.concatenate([wmat(p["q"][0]), wmat(p["k"][0]), wmat(p["v"][0])],
                           axis=1).astype(jnp.bfloat16)           # (C, 3C)
    bqkv = jnp.concatenate([p["q"][1], p["k"][1], p["v"][1]]).reshape(1, 3 * C).astype(jnp.float32)
    wp = wmat(p["proj"][0]).astype(jnp.bfloat16)
    bp = p["proj"][1].reshape(1, C).astype(jnp.float32)
    # PyTorch unpacks `b, t, c = q.shape` on an NCL tensor, so t == channel count -> C**-0.5.
    scale = float(C) ** (-0.5)

    x_spec = pl.BlockSpec((1, L, C), lambda i: (i, 0, 0))
    vec_c = pl.BlockSpec((1, C), lambda i: (0, 0))
    return pl.pallas_call(
        _make_attn_kernel(eps=_GN_EPS, scale=scale),
        out_shape=jax.ShapeDtypeStruct((B, L, C), jnp.bfloat16),
        grid=(B,),
        in_specs=[x_spec, vec_c, vec_c,
                  pl.BlockSpec((C, _NUM_GROUPS), lambda i: (0, 0)),
                  pl.BlockSpec((C, 3 * C), lambda i: (0, 0)),
                  pl.BlockSpec((1, 3 * C), lambda i: (0, 0)),
                  pl.BlockSpec((C, C), lambda i: (0, 0)),
                  vec_c],
        out_specs=pl.BlockSpec((1, L, C), lambda i: (i, 0, 0)),
        compiler_params=_compiler_params(),
    )(x, gamma, beta, oh, wqkv, bqkv, wp, bp)


def downsample_conv(x, w, b):
    """Downsample1D(with_conv=True): F.pad (0, 1) then Conv1d(k=3, stride=2, padding=0).

    The strided tap gather is done once in the wrapper as a single (B, Lout, K*Cin) slab
    (this op runs only once per down level); the kernel is then one MXU matmul."""
    B, L, Cin = x.shape
    Cout, _, K = w.shape
    stride = 2
    xpad = jnp.pad(x, ((0, 0), (0, 1), (0, 0)))
    Lp = L + 1
    Lout = (Lp - K) // stride + 1
    taps = jnp.concatenate(
        [xpad[:, k:k + stride * (Lout - 1) + 1:stride, :] for k in range(K)],
        axis=-1).astype(jnp.bfloat16)                              # (B, Lout, K*Cin)
    wflat = jnp.transpose(w, (2, 1, 0)).reshape(K * Cin, Cout).astype(jnp.bfloat16)
    bias = b.reshape(1, Cout).astype(jnp.float32)
    return pl.pallas_call(
        _matmul_bias_kernel,
        out_shape=jax.ShapeDtypeStruct((B, Lout, Cout), jnp.bfloat16),
        grid=(B,),
        in_specs=[pl.BlockSpec((1, Lout, K * Cin), lambda i: (i, 0, 0)),
                  pl.BlockSpec((K * Cin, Cout), lambda i: (0, 0)),
                  pl.BlockSpec((1, Cout), lambda i: (0, 0))],
        out_specs=pl.BlockSpec((1, Lout, Cout), lambda i: (i, 0, 0)),
        compiler_params=_compiler_params(),
    )(taps, wflat, bias)


def resnet_block(x, p):
    """ResnetBlock1D (temb=None, dropout identity at eval) as two fused pallas_calls."""
    cin = x.shape[-1]
    cout = p["conv1"][0].shape[0]
    h = fused_conv(x, *p["conv1"], gn_params=p["gn1"], silu=True)
    nin_params = p.get("nin") if cin != cout else None
    return fused_conv(h, *p["conv2"], gn_params=p["gn2"], silu=True,
                      residual=x, nin_params=nin_params)


# ----------------------------------------------------------------------------
# Parameter init (deterministic, mirrors Encoder1D.__init__ shapes)
# ----------------------------------------------------------------------------

def _init_conv(key, cout, cin, k):
    k1, k2 = jax.random.split(key)
    w = jax.random.normal(k1, (cout, cin, k), jnp.float32) * 0.05
    b = jax.random.normal(k2, (cout,), jnp.float32) * 0.05
    return (w, b)


def _init_gn(c):
    return (jnp.ones((c,), jnp.float32), jnp.zeros((c,), jnp.float32))


def _init_resnet(key, cin, cout, kernel_size):
    ks = jax.random.split(key, 3)
    p = {
        "gn1": _init_gn(cin),
        "conv1": _init_conv(ks[0], cout, cin, kernel_size),
        "gn2": _init_gn(cout),
        "conv2": _init_conv(ks[1], cout, cout, kernel_size),
    }
    if cin != cout:
        p["nin"] = _init_conv(ks[2], cout, cin, 1)
    return p


def _init_attn(key, c):
    ks = jax.random.split(key, 4)
    return {
        "gn": _init_gn(c),
        "q": _init_conv(ks[0], c, c, 1),
        "k": _init_conv(ks[1], c, c, 1),
        "v": _init_conv(ks[2], c, c, 1),
        "proj": _init_conv(ks[3], c, c, 1),
    }


def init_encoder1d_params(key, *, ch, ch_mult, num_res_blocks, attn_layers,
                          down_layers, in_channels, z_channels, double_z=True,
                          kernel_size=3):
    params = {}
    key, k = jax.random.split(key)
    params["conv_in"] = _init_conv(k, ch, in_channels, kernel_size)
    in_ch_mult = (1,) + tuple(ch_mult)
    downs = []
    block_in = ch
    for i_level in range(len(ch_mult)):
        block_in = ch * in_ch_mult[i_level]
        block_out = ch * ch_mult[i_level]
        blocks, attns = [], []
        for _ in range(num_res_blocks):
            key, k = jax.random.split(key)
            blocks.append(_init_resnet(k, block_in, block_out, kernel_size))
            block_in = block_out
            if i_level in attn_layers:
                key, k = jax.random.split(key)
                attns.append(_init_attn(k, block_in))
        level = {"block": blocks, "attn": attns}
        if i_level in down_layers:
            key, k = jax.random.split(key)
            level["down"] = _init_conv(k, block_in, block_in, 3)
        downs.append(level)
    params["down"] = downs
    key, k1, k2, k3, k4 = jax.random.split(key, 5)
    params["mid_block_1"] = _init_resnet(k1, block_in, block_in, kernel_size)
    params["mid_attn_1"] = _init_attn(k2, block_in)
    params["mid_block_2"] = _init_resnet(k3, block_in, block_in, kernel_size)
    params["norm_out"] = _init_gn(block_in)
    out_c = 2 * z_channels if double_z else z_channels
    params["conv_out"] = _init_conv(k4, out_c, block_in, kernel_size)
    return params


# ----------------------------------------------------------------------------
# Encoder1D forward
# ----------------------------------------------------------------------------

def encoder1d_forward(x_ncl, params, *, ch_mult, num_res_blocks, attn_layers, down_layers):
    # Input/output are NCL (like PyTorch); internally (B, L, C) bf16 activations.
    x = jnp.transpose(x_ncl, (0, 2, 1)).astype(jnp.bfloat16)
    h = fused_conv(x, *params["conv_in"])                       # conv_in (no norm)
    for i_level in range(len(ch_mult)):
        lvl = params["down"][i_level]
        for i_block in range(num_res_blocks):
            h = resnet_block(h, lvl["block"][i_block])
            if len(lvl["attn"]) > 0:
                h = attn_block(h, lvl["attn"][i_block])
        if i_level in down_layers:
            h = downsample_conv(h, *lvl["down"])
    h = resnet_block(h, params["mid_block_1"])
    h = attn_block(h, params["mid_attn_1"])
    h = resnet_block(h, params["mid_block_2"])
    # norm_out + SiLU fused into conv_out; final output in f32.
    h = fused_conv(h, *params["conv_out"], gn_params=params["norm_out"], silu=True,
                   out_dtype=jnp.float32)
    return jnp.transpose(h, (0, 2, 1))                          # back to NCL


# ----------------------------------------------------------------------------
# Main
# ----------------------------------------------------------------------------

if __name__ == "__main__":
    # Small but valid config: channels must be divisible by 32 (GroupNorm(32, C)).
    cfg = dict(
        ch=32,
        ch_mult=(1, 2),
        num_res_blocks=1,
        attn_layers=[1],
        down_layers=[0],
        in_channels=4,
        z_channels=4,
        double_z=True,
        kernel_size=3,
    )
    key = jax.random.PRNGKey(0)
    kp, kx = jax.random.split(key)
    params = init_encoder1d_params(kp, **cfg)

    B, Cin, L = 2, cfg["in_channels"], 16
    x = jax.random.normal(kx, (B, Cin, L), jnp.float32)   # NCL, like PyTorch

    out = encoder1d_forward(
        x, params,
        ch_mult=cfg["ch_mult"],
        num_res_blocks=cfg["num_res_blocks"],
        attn_layers=cfg["attn_layers"],
        down_layers=cfg["down_layers"],
    )
    out = jax.block_until_ready(out)
    # Expected: (B, 2*z_channels, L // 2) = (2, 8, 8)
    assert out.shape == (B, 2 * cfg["z_channels"], L // 2), out.shape
    assert bool(jnp.all(jnp.isfinite(out)))
    print("KERNEL_OK")
</pallas_src>

<mosaic_0001>
module attributes {stable_mosaic.version = 11 : i64} {
  func.func @kernel(%arg0: i32, %arg1: memref<1x16x4xbf16, #tpu.memory_space<vmem>>, %arg2: memref<3x4x32xbf16, #tpu.memory_space<vmem>>, %arg3: memref<1x32xf32, #tpu.memory_space<vmem>>, %arg4: memref<1x16x32xbf16, #tpu.memory_space<vmem>>) attributes {dimension_semantics = [#tpu.dimension_semantics<parallel>], iteration_bounds = array<i64: 2>, scalar_prefetch = 0 : i64, scratch_operands = 0 : i64, tpu.core_type = #tpu.core_type<tc>, window_params = [{transform_indices = @transform_0, window_bounds = array<i64: 1, 16, 4>}, {pipeline_mode = #tpu.pipeline_mode<synchronous>, transform_indices = @transform_1, window_bounds = array<i64: 3, 4, 32>}, {pipeline_mode = #tpu.pipeline_mode<synchronous>, transform_indices = @transform_2, window_bounds = array<i64: 1, 32>}, {transform_indices = @transform_3, window_bounds = array<i64: 1, 16, 32>}]} {
    %c0 = arith.constant 0 : index
    %c0_0 = arith.constant 0 : index
    %c0_1 = arith.constant 0 : index
    %0 = vector.load %arg1[%c0, %c0_0, %c0_1] : memref<1x16x4xbf16, #tpu.memory_space<vmem>>, vector<1x16x4xbf16>
    %1 = vector.shape_cast %0 : vector<1x16x4xbf16> to vector<16x4xbf16>
    %2 = arith.extf %1 : vector<16x4xbf16> to vector<16x4xf32>
    %cst = arith.constant 0.000000e+00 : f32
    %3 = vector.broadcast %cst : f32 to vector<1x4xf32>
    %cst_2 = arith.constant 0.000000e+00 : f32
    %4 = vector.broadcast %cst_2 : f32 to vector<1x4xf32>
    %5 = tpu.concatenate %3, %2, %4 in 0 : vector<1x4xf32>, vector<16x4xf32>, vector<1x4xf32> -> vector<18x4xf32>
    %6 = vector.extract_strided_slice %5 {offsets = [0, 0], sizes = [16, 4], strides = [1, 1]} : vector<18x4xf32> to vector<16x4xf32>
    %7 = arith.truncf %6 : vector<16x4xf32> to vector<16x4xbf16>
    %c0_3 = arith.constant 0 : index
    %c0_4 = arith.constant 0 : index
    %c0_5 = arith.constant 0 : index
    %8 = vector.load %arg2[%c0_3, %c0_4, %c0_5] : memref<3x4x32xbf16, #tpu.memory_space<vmem>>, vector<1x4x32xbf16>
    %9 = vector.shape_cast %8 : vector<1x4x32xbf16> to vector<4x32xbf16>
    %cst_6 = arith.constant dense<0.000000e+00> : vector<16x32xf32>
    %10 = tpu.matmul %7, %9, %cst_6 {dimension_numbers = #tpu.dot_dimension_numbers<[1], [0], [0], [1], [0, 0, 1, 1], [], []>} : vector<16x4xbf16>, vector<4x32xbf16>, vector<16x32xf32> -> vector<16x32xf32>
    %11 = vector.extract_strided_slice %5 {offsets = [1, 0], sizes = [16, 4], strides = [1, 1]} : vector<18x4xf32> to vector<16x4xf32>
    %12 = arith.truncf %11 : vector<16x4xf32> to vector<16x4xbf16>
    %c1 = arith.constant 1 : index
    %c0_7 = arith.constant 0 : index
    %c0_8 = arith.constant 0 : index
    %13 = vector.load %arg2[%c1, %c0_7, %c0_8] : memref<3x4x32xbf16, #tpu.memory_space<vmem>>, vector<1x4x32xbf16>
    %14 = vector.shape_cast %13 : vector<1x4x32xbf16> to vector<4x32xbf16>
    %cst_9 = arith.constant dense<0.000000e+00> : vector<16x32xf32>
    %15 = tpu.matmul %12, %14, %cst_9 {dimension_numbers = #tpu.dot_dimension_numbers<[1], [0], [0], [1], [0, 0, 1, 1], [], []>} : vector<16x4xbf16>, vector<4x32xbf16>, vector<16x32xf32> -> vector<16x32xf32>
    %16 = arith.addf %10, %15 : vector<16x32xf32>
    %17 = vector.extract_strided_slice %5 {offsets = [2, 0], sizes = [16, 4], strides = [1, 1]} : vector<18x4xf32> to vector<16x4xf32>
    %18 = arith.truncf %17 : vector<16x4xf32> to vector<16x4xbf16>
    %c2 = arith.constant 2 : index
    %c0_10 = arith.constant 0 : index
    %c0_11 = arith.constant 0 : index
    %19 = vector.load %arg2[%c2, %c0_10, %c0_11] : memref<3x4x32xbf16, #tpu.memory_space<vmem>>, vector<1x4x32xbf16>
    %20 = vector.shape_cast %19 : vector<1x4x32xbf16> to vector<4x32xbf16>
    %cst_12 = arith.constant dense<0.000000e+00> : vector<16x32xf32>
    %21 = tpu.matmul %18, %20, %cst_12 {dimension_numbers = #tpu.dot_dimension_numbers<[1], [0], [0], [1], [0, 0, 1, 1], [], []>} : vector<16x4xbf16>, vector<4x32xbf16>, vector<16x32xf32> -> vector<16x32xf32>
    %22 = arith.addf %16, %21 : vector<16x32xf32>
    %c0_13 = arith.constant 0 : index
    %c0_14 = arith.constant 0 : index
    %23 = vector.load %arg3[%c0_13, %c0_14] : memref<1x32xf32, #tpu.memory_space<vmem>>, vector<1x32xf32>
    %24 = vector.broadcast %23 : vector<1x32xf32> to vector<16x32xf32>
    %25 = arith.addf %22, %24 : vector<16x32xf32>
    %26 = arith.truncf %25 : vector<16x32xf32> to vector<16x32xbf16>
    %c0_15 = arith.constant 0 : index
    %c0_16 = arith.constant 0 : index
    %c0_17 = arith.constant 0 : index
    %27 = vector.load %arg4[%c0_15, %c0_16, %c0_17] : memref<1x16x32xbf16, #tpu.memory_space<vmem>>, vector<1x16x32xbf16>
    %28 = vector.shape_cast %27 : vector<1x16x32xbf16> to vector<16x32xbf16>
    %29 = vector.shape_cast %26 : vector<16x32xbf16> to vector<1x16x32xbf16>
    tpu.vector_store %arg4[%c0_15, %c0_16, %c0_17], %29 {strides = array<i32>} : memref<1x16x32xbf16, #tpu.memory_space<vmem>>, vector<1x16x32xbf16>,
    return
  }
  func.func @transform_0(%arg0: i32) -> (i32, i32, i32) {
    %c0_i32 = arith.constant 0 : i32
    %c0_i32_0 = arith.constant 0 : i32
    %c0_i32_1 = arith.constant 0 : i32
    return %arg0, %c0_i32, %c0_i32_0 : i32, i32, i32
  }
  func.func @transform_1(%arg0: i32) -> (i32, i32, i32) {
    %c0_i32 = arith.constant 0 : i32
    %c0_i32_0 = arith.constant 0 : i32
    %c0_i32_1 = arith.constant 0 : i32
    %c0_i32_2 = arith.constant 0 : i32
    return %c0_i32, %c0_i32_0, %c0_i32_1 : i32, i32, i32
  }
  func.func @transform_2(%arg0: i32) -> (i32, i32) {
    %c0_i32 = arith.constant 0 : i32
    %c0_i32_0 = arith.constant 0 : i32
    %c0_i32_1 = arith.constant 0 : i32
    return %c0_i32, %c0_i32_0 : i32, i32
  }
  func.func @transform_3(%arg0: i32) -> (i32, i32, i32) {
    %c0_i32 = arith.constant 0 : i32
    %c0_i32_0 = arith.constant 0 : i32
    %c0_i32_1 = arith.constant 0 : i32
    return %arg0, %c0_i32, %c0_i32_0 : i32, i32, i32
  }
}

</mosaic_0001>

<bundles_post_ra>
// kernel: tpu_custom_call.1
= control target key start
LH: loop header
LB: loop body
LE: loop exit
PB: predicated region body
PF: predicated region fallthrough
CT: control target
= control target key end

     0   :  { %8 = vsyncpa [#allocation3], 0  ;;  %s759_s0 = inlined_call_operand.vmem [shape: bf16[2,16,4], index: 0, kind: input, shape index: {}]   ;;  %s760_s1 = inlined_call_operand.vmem [shape: bf16[3,4,32], index: 1, kind: input, shape index: {}]   ;;  %s761_s2 = inlined_call_operand.vmem [shape: f32[1,32], index: 2, kind: input, shape index: {}]   ;;  %s762_s3 = inlined_call_operand.hbm [shape: bf16[2,16,32], index: 3, kind: output, shape index: {}]  }
   0x1   :  { %10 = vsyncpa [#allocation3 + $0x1], 0  ;;  %s635_s12 = smov 0   ;;  %s637_s13 = smov 0  }
   0x2   :  { %s639_s14 = smov 0   ;;  %s641_s15 = smov 0  }
   0x3 LB: > { %s656_s16 = sadd.s32 4294967295, %s608_s15   ;;  %s451_s17 = sadd.s32 4294967294, %s608_s15   ;;  %s608_s15 = sphi %s641_s15, %s768_s15   ;;  %s604_s14 = sphi %s639_s14, %s767_s14   ;;  %s600_s13 = sphi %s637_s13, %s766_s13   ;;  %s596_s12 = sphi %s635_s12, %s765_s12  }
   0x4   : > { %s660_s18 = sadd.s32 1, %s608_s15   ;;  %s91_s19 = sadd.s32 1, %s604_s14 }
   0x5   : > { %s88_s20 = ssub.s32 %s608_s15, %s660_s18  ;;  %p101_p0 = scmp.ne.s32.totalorder %s604_s14, %s600_s13 }
   0x6   : > { %p89_p1 = scmp.eq.s32.totalorder %s88_s20, 0  ;;  %p102_p2 = scmp.eq.s32.totalorder %s656_s16, 1 }
   0x7   : > { %p107_p3 = scmp.ne.s32.totalorder %s600_s13, %s596_s12  ;;  %p108_p4 = scmp.eq.s32.totalorder %s451_s17, 1 }
   0x8   : > { %s671_s21 = scalar_select %p89_p1, %s604_s14, %s91_s19  }
   0x9   : > { %p673_p5 = por %p102_p2, %p101_p0  ;;  %p677_p6 = por %p108_p4, %p107_p3 }
   0xa   : > { %p454_p7 = scmp.ge.s32.totalorder %s608_s15, 1  ;;  %p140_p8 = scmp.lt.s32.totalorder %s608_s15, 3 }
   0xc   : > { %p141_p9 = pnand %p454_p7, %p140_p8 }
   0xd   : > { %v458_v0 = vld [vmem:[%s760_s1 + $0x2] sm:$0x3] (!%p141_p9)  ;;  %vm207_vm0 = vcmask (!%p141_p9), 1041408   ;;  %v186_v1 = vld [vmem:[%s760_s1] sm:$0x3] (!%p141_p9)  ;;  %v610_v2 = vmov (!%p141_p9), 0.0  }
   0xe   : > { %144 = sbr.rel (%p141_p9) target bundleno = 283 (0x11b), region = 32  ;;  %485 = vmatprep.subr.bf16.mxu0 (!%p141_p9), %v610_v2  ;;  %v209_v3 = vsel (!%p141_p9), %vm207_vm0, %v458_v0, 0  ;;  %491 = vmatprep.subr.bf16.mxu1 (!%p141_p9), %v610_v2  ;;  %v255_v4 = vsel (!%p141_p9), %vm207_vm0, %v186_v1, 0  ;;  %p164_p10 = scmp.lt.s32.totalorder (!%p141_p9), %s656_s16, 1  ;;  %vm611_vm1 = vmmov (!%p141_p9), 0   ;;  %vm176_vm2 = vcmask (!%p141_p9), 1040384  }
   0xf   : > { %486 = vmatpush3.bf16.msra.mxu0 (!%p141_p9), %v209_v3  ;;  %492 = vmatpush3.bf16.msra.mxu1 (!%p141_p9), %v255_v4  ;;  %vm203_vm3 = vcmask (!%p141_p9), 31744   ;;  %v461_v20 = vld [vmem:[%s760_s1 + $0x4] sm:$0x3] (!%p141_p9)  ;;  %vm190_vm4 = vsmask.f32 (!%p141_p9), 7424  ;;  %vm302_vm5 = vcmask (!%p141_p9), 1046528  }
  0x10   : > { %487 = vmatprep.mubr.msk.bf16.mxu0 (!%p141_p9), %vm611_vm1, %v610_v2  ;;  %493 = vmatprep.mubr.msk.bf16.mxu1 (!%p141_p9), %vm611_vm1, %v610_v2  ;;  %v310_v22 = vsel (!%p141_p9), %vm207_vm0, %v461_v20, 0  ;;  %s161_s8 = sand.u32 (!%p141_p9), 1, %s600_s13   ;;  %v463_v38 = vld [vmem:[%s761_s2] ss:$0 sm:$0xff] (!%p141_p9)  ;;  %s474_s17 = sshll.u32 (!%p141_p9), %s656_s16, 7  ;;  %vm372_vm6 = vcmask (!%p141_p9), 257024  }
  0x11   : > { %497 = vmatprep.subr.bf16.mxu0 (!%p141_p9), %v610_v2  ;;  %s455_s9 = sshll.u32 (!%p141_p9), %s161_s8, 3  ;;  %s714_s26 = scalar_lea.hbm (!%p141_p9), %s762_s3, %s474_s17 }
  0x12   : > { %s163_s19 = scalar_lea.vmem (!%p141_p9), [#allocation2], %s455_s9  ;;  %s718_s27 = scalar_lea.sflag (!%p141_p9), [#allocation3], %s161_s8 }
  0x13   : > { %s389_s20 = sshll.u32 (!%p141_p9), %s163_s19, 4  ;;  %s716_s20 = int_to_ptr.vmem [resolvable:$true] %s389_s20 }
  0x15   : > { %s165_s28 = scalar_select %p164_p10, %s656_s16, 1 }
  0x16   : > { %s546_s16 = scalar_lea.vmem %s716_s20, 128 }
  0x17   : > { %s471_s29 = sshll.u32 %s165_s28, 3  ;;  %p547_p11 = scmp.ne.s32.totalorder %s716_s20, %s546_s16 }
  0x18   : > { %s168_s5 = scalar_lea.vmem %s759_s0, %s471_s29  ;;  %s612_s28 = smov [#allocation2]  }
  0x19   : > { %v476_v5 = vld [vmem:[%s168_s5] sm:$0xff]   ;;  %p548_p12 = pnand %p547_p11, %p673_p5  ;;  %s550_s29 = sshll.u32 %s612_s28, 4  ;;  %s551_s29 = int_to_ptr.vmem [resolvable:$false] %s550_s29 }
  0x1a   : > { %v477_v6 = vunpack.c.l.bf16 %v476_v5  ;;  %v478_v7 = vunpack.c.h.bf16 %v476_v5  ;;  %s552_s30 = scalar_lea.vmem %s551_s29, 256  ;;  %p553_p0 = scmp.lt.s32.totalorder %s716_s20, %s551_s29 }
  0x1b   : > { %p549_p13 = pneg %p548_p12  ;;  %p554_p1 = scmp.lt.s32.totalorder %s552_s30, %s546_s16 }
  0x1c   : > { %v177_v8 = vrot.slane %v477_v6, 7  ;;  %v178_v9 = vrot.slane %v478_v7, 7 }
  0x1d   : > { %p555_p2 = por %p554_p1, %p553_p0 }
  0x1e   : > { %v179_v10 = vsel %vm176_vm2, %v177_v8, %v178_v9  ;;  %v183_v11 = vsel %vm176_vm2, 0.0, %v177_v8  ;;  %v184_v12 = vsel %vm176_vm2, %v178_v9, 0.0 }
  0x1f   : > { %v185_v13 = vpack.c.bf16 %v179_v10, %v183_v11  ;;  %v187_v14 = vpack.c.bf16 %v184_v12, %v184_v12  ;;  %p556_p3 = pnand %p555_p2, %p549_p13 }
  0x21   : > { %v192_v15 = vshrl.u32 %v185_v13, 16  ;;  %v194_v16 = vshll.u32 %v185_v13, 16  ;;  %v199_v17 = vshll.u32 %v187_v14, 16  ;;  %494 = vmatmul.mubr.msk.bf16.vlgmr.msra.gmra.mrb[0].mxu1 %vm203_vm3, %v185_v13  ;;  %v303_v24 = vrot.slane %v185_v13, 1 }
  0x22   : > { %v304_v25 = vrot.slane %v187_v14, 1 }
  0x23   : > { %v196_v18 = vrot.slane %v194_v16, 1  ;;  %v201_v19 = vrot.slane %v199_v17, 1 }
  0x24   : > { %v305_v26 = vsel %vm302_vm5, %v303_v24, %v304_v25 }
  0x25   : > { %v197_v21 = vor.u32 %v196_v18, %v192_v15 }
  0x27   : > { %v202_v23 = vsel %vm190_vm4, %v197_v21, %v201_v19 }
  0x28   : > { %488 = vmatmul.mubr.msk.bf16.vlgmr.msra.gmra.mrb[0].mxu0 %vm203_vm3, %v202_v23 }
  0x29   : > { %498 = vmatpush3.bf16.msra.mxu0 %v310_v22  ;;  %499 = vmatprep.mubr.msk.bf16.mxu0 %vm611_vm1, %v610_v2 }
  0x30   : > { %500 = vmatmul.mubr.msk.bf16.vlgmr.msra.gmra.mrb[4].mxu0 %vm203_vm3, %v305_v26 }
  0xf4   : > { %v291_v27 = vpop.f32.mrb[0].mxu1 }
  0xf5   : > { %v495_v28 = vpop.f32.mrb[1].mxu1 }
  0xf6   : > { %v294_v29 = vpop.f32.mrb[2].mxu1 }
  0xf7   : > { %v496_v30 = vpop.f32.mrb[3].mxu1 }
  0xfb   : > { %v245_v31 = vpop.f32.mrb[0].mxu0 }
  0xfc   : > { %v292_v32 = vadd.f32 %v291_v27, %v245_v31  ;;  %v489_v33 = vpop.f32.mrb[1].mxu0 }
  0xfd   : > { %v248_v34 = vpop.f32.mrb[2].mxu0 }
  0xfe   : > { %v295_v35 = vadd.f32 %v294_v29, %v248_v34  ;;  %v490_v36 = vpop.f32.mrb[3].mxu0 }
 0x103   : > { %v346_v37 = vpop.f32.mrb[4].mxu0 }
 0x104   : > { %v353_v39 = vadd.f32 %v346_v37, %v292_v32  ;;  %v501_v40 = vpop.f32.mrb[5].mxu0 }
 0x105   : > { %v349_v41 = vpop.f32.mrb[6].mxu0 }
 0x106   : > { %v362_v42 = vadd.f32 %v463_v38, %v353_v39  ;;  %v354_v43 = vadd.f32 %v349_v41, %v295_v35  ;;  %v502_v44 = vpop.f32.mrb[7].mxu0 }
 0x108   : > { %v472_v45 = vpack.c.bf16 %v362_v42, %v362_v42  ;;  %v363_v46 = vadd.f32 %v463_v38, %v354_v43 }
 0x10a   : > { %373 = vst.msk [vmem:[%s163_s19] sm:$0xf] %vm372_vm6, %v472_v45  ;;  %v473_v47 = vpack.c.bf16 %v363_v46, %v363_v46 }
 0x10c   : > { %374 = vst.msk [vmem:[%s163_s19 + $0x4] sm:$0xf] %vm372_vm6, %v473_v47 }
 0x10d   : > { %559 = shalt.err (!%p556_p3)
}
 0x10e   : > { %s560_s4 = scalar_lea.hbm %s714_s26, 128  ;;  %s564_s7 = scalar_lea.hbm %s762_s3, 256 }
 0x10f   : > { %p561_p4 = scmp.ne.s32.totalorder %s714_s26, %s560_s4  ;;  %p565_p9 = scmp.lt.u32.totalorder %s714_s26, %s762_s3 }
 0x110   : > { %p566_p10 = scmp.lt.u32.totalorder %s564_s7, %s560_s4  ;;  %p568_p12 = scmp.lt.u32.totalorder %s560_s4, %s714_s26 }
 0x111   : > { %p562_p7 = pnand %p561_p4, %p673_p5 }
 0x112   : > { %p567_p11 = por %p566_p10, %p565_p9 }
 0x113   : > { %p563_p8 = pneg %p562_p7 }
 0x114   : > { %p569_p13 = por %p568_p12, %p567_p11 }
 0x116   : > { %p570_p0 = pnand %p569_p13, %p563_p8 }
 0x118   : > { %573 = shalt.err (!%p570_p0)
}
 0x119   : > { %s613_s10 = smov 64   ;;  %s614_s11 = smov 4  }
 0x11a   : > { %503 = dma.vmem_to_hbm [thread:$0]  (%p673_p5), %s716_s20, 128, %s714_s26, %s718_s27, %s613_s10, %s613_s10, %s614_s11  }
 0x11b PF: > { %p509_p1 = scmp.ge.s32.totalorder %s608_s15, 2  ;;  %s404_s17 = sand.u32 1, %s596_s12  }
 0x11c   : > { %s405_s19 = scalar_lea.sflag [#allocation3], %s404_s17 }
 0x11d   : > { %p506_p2 = pnand %p509_p1, %p677_p6 }
 0x11f   : > { %591 = dma.done.wait (!%p506_p2), %s405_s19, 128  }
 0x120   : > { %593 = vsyncadd (!%p506_p2), %s405_s19, 4294967168  ;;  %p13_p3 = scmp.ge.s32.totalorder %s660_s18, 4   ;;  %s765_s12 = smov %s600_s13 }
 0x121   : > { %s766_s13 = smov %s604_s14  ;;  %s767_s14 = smov %s671_s21 }
 0x122   : > { %s768_s15 = smov %s660_s18  ;;  %15 = sbr.rel (!%p13_p3) target bundleno = 3 (0x3), region = 69 }
 0x129   :  { %410 = vsyncpa [#allocation3], 1 }
 0x12a   :  { %412 = vsyncpa [#allocation3 + $0x1], 1 }

</bundles_post_ra>
